<compile_context>
chip_gen: v6e
topology: v6e:2x2x1
jax: 0.10.0
libtpu: 0.0.40
codegen_flags: <defaults>
</compile_context>

<pallas_src>
import functools

import jax
import jax.numpy as jnp
from jax import lax
from jax.experimental import pallas as pl
from jax.experimental.pallas import tpu as pltpu

EPS = 1e-5


def _round_up(x, m):
    return ((x + m - 1) // m) * m


def _vmem_budget():
    """Generation-aware scoped-VMEM budget (~80% of physical per TensorCore)."""
    cap = 64 << 20                       # conservative fallback (v7x physical)
    try:
        info = pltpu.get_tpu_info()
        cap = int(getattr(info, "vmem_capacity_bytes", cap))
    except Exception:
        pass
    return max(int(cap * 0.80), 16 << 20)


def _pick_tile_rows(N, H, W, Cin, Cout, in_itemsize, out_itemsize, budget):
    """Pick rows-per-step TH (divides H): largest tile that fits the VMEM budget
    while still giving >= ~8 grid steps (>= 4 per v7x TensorCore) if possible."""
    cin_l = _round_up(Cin, 128)          # lane-padded widths (physical VMEM)
    cout_l = _round_up(Cout, 128)

    def step_bytes(th):
        rows, ext = th * W, (th + 2) * W
        blocks = 2 * (rows * cin_l * in_itemsize        # x tile (double-buffered)
                      + 2 * W * cin_l * in_itemsize     # two halo rows
                      + rows * cout_l * out_itemsize    # output tile
                      + 4 * cin_l * 4                   # folded IN params
                      + 10 * Cin * cout_l * 4)          # packed weights
        live = (5 * ext + 3 * rows) * cin_l * 4 + 2 * rows * cout_l * 4
        return blocks + live + (2 << 20)                # slack for internal scratch

    divisors = [d for d in range(1, H + 1) if H % d == 0]
    fitting = [d for d in divisors if step_bytes(d) <= budget] or [1]
    aligned = [d for d in fitting if (d * W) % 8 == 0]
    cand = aligned or fitting
    enough_steps = [d for d in cand if N * (H // d) >= 8]
    return max(enough_steps) if enough_steps else max(cand)


def _two_conv_block_in_kernel(TH, W, Cin, Cout, n_row_tiles, matmul_dtype,
                              x_ref, up_ref, dn_ref, p_ref, wp_ref, o_ref):
    rows = TH * W
    ext_rows = (TH + 2) * W
    t = pl.program_id(1)                               # row-tile index

    # folded InstanceNorm affine (per image, precomputed in the wrapper)
    prm = p_ref[...].reshape(4, Cin)                   # f32 (4, Cin)
    s1, h1 = prm[0:1, :], prm[1:2, :]
    s2, h2 = prm[2:3, :], prm[3:4, :]

    x = x_ref[...].reshape(rows, Cin).astype(jnp.float32)
    up = up_ref[...].reshape(W, Cin).astype(jnp.float32)
    dn = dn_ref[...].reshape(W, Cin).astype(jnp.float32)

    # branch 1: IN + ReLU (single FMA), feeds the 1x1 conv
    y1 = jnp.maximum(x * s1 + h1, 0.0)

    # branch 2: IN + ReLU on the tile and its two halo rows; halos that fall
    # outside the image are zeroed AFTER relu == the conv's zero padding.
    y2 = jnp.maximum(x * s2 + h2, 0.0)
    y2u = jnp.maximum(up * s2 + h2, 0.0) * (t > 0).astype(jnp.float32)
    y2d = jnp.maximum(dn * s2 + h2, 0.0) * (t < n_row_tiles - 1).astype(jnp.float32)
    ext = jnp.concatenate([y2u, y2, y2d], axis=0)      # ((TH+2)*W, Cin)

    # +-1 column shifts via XLU roll + hoisted boundary masks; the +-W row
    # shifts below become static sublane-aligned slices of `ext` (free).
    w_idx = lax.broadcasted_iota(jnp.int32, (ext_rows, 1), 0) % W
    col = {
        0: ext,
        -1: pltpu.roll(ext, 1, axis=0) * (w_idx >= 1).astype(jnp.float32),
        1: pltpu.roll(ext, ext_rows - 1, axis=0) * (w_idx <= W - 2).astype(jnp.float32),
    }

    # 1x1 conv + the nine 3x3 taps: ten accumulating MXU dots, f32 accumulation.
    acc = jnp.dot(y1.astype(matmul_dtype), wp_ref[0],
                  preferred_element_type=jnp.float32)  # (rows, Cout)
    k = 1
    for dh in (-1, 0, 1):
        r0 = (1 + dh) * W
        for dw in (-1, 0, 1):
            tap = col[dw][r0:r0 + rows, :]
            acc = acc + jnp.dot(tap.astype(matmul_dtype), wp_ref[k],
                                preferred_element_type=jnp.float32)
            k += 1

    o_ref[...] = acc.reshape(1, TH, W, Cout).astype(o_ref.dtype)


def two_conv_block_in_nhwc(x, w1, w2, g1, b1, g2, b2, *,
                           matmul_dtype=jnp.bfloat16, out_dtype=None):
    """Channels-last entry point: x (N, H, W, Cin) -> (N, H, W, Cout).
    matmul_dtype=jnp.float32 gives exact f32 parity; bfloat16 (default) uses the
    MXU natively with f32 accumulation.  out_dtype defaults to x.dtype."""
    N, H, W, Cin = x.shape
    Cout = w1.shape[0]
    out_dtype = x.dtype if out_dtype is None else jnp.dtype(out_dtype)

    # Per-(n, c) IN statistics: cheap two-pass reduction (enables spatial
    # tiling), folded with the affine so the kernel does a single FMA/branch.
    xf = x.astype(jnp.float32)
    mean = jnp.mean(xf, axis=(1, 2))                           # (N, Cin)
    inv = lax.rsqrt(jnp.var(xf, axis=(1, 2)) + EPS)            # biased (PyTorch IN)
    g1f, b1f, g2f, b2f = (p.astype(jnp.float32) for p in (g1, b1, g2, b2))
    s1 = inv * g1f[None, :]
    s2 = inv * g2f[None, :]
    params = jnp.stack([s1, b1f[None, :] - mean * s1,
                        s2, b2f[None, :] - mean * s2], axis=1)  # (N, 4, Cin)

    # Packed weights: wp[0] = 1x1 tap, wp[1 + 3*kh + kw] = 3x3 tap (kh, kw),
    # each (Cin, Cout).  Cout is NOT padded (no write amplification).
    w1m = w1.reshape(Cout, Cin).T[None]                         # (1, Cin, Cout)
    w2m = jnp.transpose(w2, (2, 3, 1, 0)).reshape(9, Cin, Cout)
    wp = jnp.concatenate([w1m, w2m], axis=0).astype(matmul_dtype)

    budget = _vmem_budget()
    TH = _pick_tile_rows(N, H, W, Cin, Cout, x.dtype.itemsize,
                         jnp.dtype(out_dtype).itemsize, budget)
    nT = H // TH

    kernel = functools.partial(_two_conv_block_in_kernel,
                               TH, W, Cin, Cout, nT, matmul_dtype)

    return pl.pallas_call(
        kernel,
        out_shape=jax.ShapeDtypeStruct((N, H, W, Cout), out_dtype),
        grid=(N, nT),
        in_specs=[
            # main tile + one image-row halo above / below (same array passed
            # three times; out-of-image halos clamped here, zeroed in-kernel).
            pl.BlockSpec((1, TH, W, Cin), lambda n, t: (n, t, 0, 0)),
            pl.BlockSpec((1, 1, W, Cin),
                         lambda n, t: (n, jnp.maximum(t * TH - 1, 0), 0, 0)),
            pl.BlockSpec((1, 1, W, Cin),
                         lambda n, t: (n, jnp.minimum((t + 1) * TH, H - 1), 0, 0)),
            pl.BlockSpec((1, 4, Cin), lambda n, t: (n, 0, 0)),
            pl.BlockSpec((10, Cin, Cout), lambda n, t: (0, 0, 0)),
        ],
        out_specs=pl.BlockSpec((1, TH, W, Cout), lambda n, t: (n, t, 0, 0)),
        compiler_params=pltpu.CompilerParams(
            dimension_semantics=("parallel", "parallel"),
            vmem_limit_bytes=budget),
    )(x, x, x, params, wp)


def two_conv_block_in(x, w1, w2, g1, b1, g2, b2, **kw):
    """NCHW interface (PyTorch parity).  The two transposes below are the only
    wrapper-side HBM passes left; channels-last callers should use
    two_conv_block_in_nhwc directly and skip them."""
    x_nhwc = jnp.transpose(x, (0, 2, 3, 1))          # keeps caller dtype
    out = two_conv_block_in_nhwc(x_nhwc, w1, w2, g1, b1, g2, b2, **kw)
    return jnp.transpose(out, (0, 3, 1, 2))


def _reference(x, w1, w2, g1, b1, g2, b2):
    """Pure-JAX reference mirroring the PyTorch TwoConvBlockIN forward (NCHW)."""
    def inorm(x, g, b):
        mean = jnp.mean(x, axis=(2, 3), keepdims=True)
        var = jnp.var(x, axis=(2, 3), keepdims=True)          # biased, like PyTorch IN
        xn = (x - mean) / jnp.sqrt(var + EPS)
        return xn * g[None, :, None, None] + b[None, :, None, None]

    dn = ("NCHW", "OIHW", "NCHW")
    y1 = jax.nn.relu(inorm(x, g1, b1))
    o1 = lax.conv_general_dilated(y1, w1, (1, 1), "VALID", dimension_numbers=dn)
    y2 = jax.nn.relu(inorm(x, g2, b2))
    o2 = lax.conv_general_dilated(y2, w2, (1, 1), ((1, 1), (1, 1)),
                                  dimension_numbers=dn)
    return o1 + o2


if __name__ == "__main__":
    N, Cin, Cout, H, W = 2, 4, 8, 16, 16
    key = jax.random.PRNGKey(0)
    k = jax.random.split(key, 7)

    x = jax.random.normal(k[0], (N, Cin, H, W), jnp.float32)
    # deterministic synthetic parameters (shapes match the nn.Module __init__)
    w1 = 0.2 * jax.random.normal(k[1], (Cout, Cin, 1, 1), jnp.float32)
    w2 = 0.2 * jax.random.normal(k[2], (Cout, Cin, 3, 3), jnp.float32)
    g1 = 1.0 + 0.1 * jax.random.normal(k[3], (Cin,), jnp.float32)
    b1 = 0.1 * jax.random.normal(k[4], (Cin,), jnp.float32)
    g2 = 1.0 + 0.1 * jax.random.normal(k[5], (Cin,), jnp.float32)
    b2 = 0.1 * jax.random.normal(k[6], (Cin,), jnp.float32)

    ref = jax.block_until_ready(_reference(x, w1, w2, g1, b1, g2, b2))

    # exact-parity run (f32 matmul)
    out_f32 = jax.block_until_ready(
        two_conv_block_in(x, w1, w2, g1, b1, g2, b2, matmul_dtype=jnp.float32))
    if not bool(jnp.allclose(out_f32, ref, atol=1e-4, rtol=1e-4)):
        raise AssertionError(
            f"f32 mismatch: max abs err = {float(jnp.max(jnp.abs(out_f32 - ref)))}")

    # default run (bf16 MXU operands, f32 accumulation) — loosened tolerance
    # only reflects bf16 operand rounding.
    out_bf = jax.block_until_ready(two_conv_block_in(x, w1, w2, g1, b1, g2, b2))
    if not bool(jnp.allclose(out_bf, ref, atol=5e-2, rtol=5e-2)):
        raise AssertionError(
            f"bf16 mismatch: max abs err = {float(jnp.max(jnp.abs(out_bf - ref)))}")

    print("KERNEL_OK")
</pallas_src>

<mosaic_0001>
module attributes {stable_mosaic.version = 11 : i64} {
  func.func @_two_conv_block_in_kernel(%arg0: i32, %arg1: i32, %arg2: memref<1x4x16x4xf32, #tpu.memory_space<vmem>>, %arg3: memref<1x1x16x4xf32, #tpu.memory_space<vmem>>, %arg4: memref<1x1x16x4xf32, #tpu.memory_space<vmem>>, %arg5: memref<1x4x4xf32, #tpu.memory_space<vmem>>, %arg6: memref<10x4x8xf32, #tpu.memory_space<vmem>>, %arg7: memref<1x4x16x8xf32, #tpu.memory_space<vmem>>) attributes {dimension_semantics = [#tpu.dimension_semantics<parallel>, #tpu.dimension_semantics<parallel>], iteration_bounds = array<i64: 2, 4>, scalar_prefetch = 0 : i64, scratch_operands = 0 : i64, tpu.core_type = #tpu.core_type<tc>, window_params = [{transform_indices = @transform_0, window_bounds = array<i64: 1, 4, 16, 4>}, {transform_indices = @transform_1, window_bounds = array<i64: 1, 1, 16, 4>}, {transform_indices = @transform_2, window_bounds = array<i64: 1, 1, 16, 4>}, {transform_indices = @transform_3, window_bounds = array<i64: 1, 4, 4>}, {pipeline_mode = #tpu.pipeline_mode<synchronous>, transform_indices = @transform_4, window_bounds = array<i64: 10, 4, 8>}, {transform_indices = @transform_5, window_bounds = array<i64: 1, 4, 16, 8>}]} {
    %c0 = arith.constant 0 : index
    %c0_0 = arith.constant 0 : index
    %c0_1 = arith.constant 0 : index
    %0 = vector.load %arg5[%c0, %c0_0, %c0_1] : memref<1x4x4xf32, #tpu.memory_space<vmem>>, vector<1x4x4xf32>
    %1 = vector.shape_cast %0 : vector<1x4x4xf32> to vector<4x4xf32>
    %2 = vector.extract_strided_slice %1 {offsets = [0, 0], sizes = [1, 4], strides = [1, 1]} : vector<4x4xf32> to vector<1x4xf32>
    %3 = vector.extract_strided_slice %1 {offsets = [1, 0], sizes = [1, 4], strides = [1, 1]} : vector<4x4xf32> to vector<1x4xf32>
    %4 = vector.extract_strided_slice %1 {offsets = [2, 0], sizes = [1, 4], strides = [1, 1]} : vector<4x4xf32> to vector<1x4xf32>
    %5 = vector.extract_strided_slice %1 {offsets = [3, 0], sizes = [1, 4], strides = [1, 1]} : vector<4x4xf32> to vector<1x4xf32>
    %c0_2 = arith.constant 0 : index
    %c0_3 = arith.constant 0 : index
    %c0_4 = arith.constant 0 : index
    %c0_5 = arith.constant 0 : index
    %6 = vector.load %arg2[%c0_2, %c0_3, %c0_4, %c0_5] : memref<1x4x16x4xf32, #tpu.memory_space<vmem>>, vector<1x4x16x4xf32>
    %7 = vector.shape_cast %6 : vector<1x4x16x4xf32> to vector<64x4xf32>
    %c0_6 = arith.constant 0 : index
    %c0_7 = arith.constant 0 : index
    %c0_8 = arith.constant 0 : index
    %c0_9 = arith.constant 0 : index
    %8 = vector.load %arg3[%c0_6, %c0_7, %c0_8, %c0_9] : memref<1x1x16x4xf32, #tpu.memory_space<vmem>>, vector<1x1x16x4xf32>
    %9 = vector.shape_cast %8 : vector<1x1x16x4xf32> to vector<16x4xf32>
    %c0_10 = arith.constant 0 : index
    %c0_11 = arith.constant 0 : index
    %c0_12 = arith.constant 0 : index
    %c0_13 = arith.constant 0 : index
    %10 = vector.load %arg4[%c0_10, %c0_11, %c0_12, %c0_13] : memref<1x1x16x4xf32, #tpu.memory_space<vmem>>, vector<1x1x16x4xf32>
    %11 = vector.shape_cast %10 : vector<1x1x16x4xf32> to vector<16x4xf32>
    %12 = vector.broadcast %2 : vector<1x4xf32> to vector<64x4xf32>
    %13 = arith.mulf %7, %12 : vector<64x4xf32>
    %14 = vector.broadcast %3 : vector<1x4xf32> to vector<64x4xf32>
    %15 = arith.addf %13, %14 : vector<64x4xf32>
    %cst = arith.constant 0.000000e+00 : f32
    %16 = vector.broadcast %cst : f32 to vector<64x4xf32>
    %17 = arith.maximumf %15, %16 : vector<64x4xf32>
    %18 = vector.broadcast %4 : vector<1x4xf32> to vector<64x4xf32>
    %19 = arith.mulf %7, %18 : vector<64x4xf32>
    %20 = vector.broadcast %5 : vector<1x4xf32> to vector<64x4xf32>
    %21 = arith.addf %19, %20 : vector<64x4xf32>
    %cst_14 = arith.constant 0.000000e+00 : f32
    %22 = vector.broadcast %cst_14 : f32 to vector<64x4xf32>
    %23 = arith.maximumf %21, %22 : vector<64x4xf32>
    %24 = vector.broadcast %4 : vector<1x4xf32> to vector<16x4xf32>
    %25 = arith.mulf %9, %24 : vector<16x4xf32>
    %26 = vector.broadcast %5 : vector<1x4xf32> to vector<16x4xf32>
    %27 = arith.addf %25, %26 : vector<16x4xf32>
    %cst_15 = arith.constant 0.000000e+00 : f32
    %28 = vector.broadcast %cst_15 : f32 to vector<16x4xf32>
    %29 = arith.maximumf %27, %28 : vector<16x4xf32>
    %c0_i32 = arith.constant 0 : i32
    %30 = arith.cmpi sgt, %arg1, %c0_i32 : i32
    %31 = arith.extui %30 : i1 to i32
    %32 = arith.sitofp %31 : i32 to f32
    %33 = vector.broadcast %32 : f32 to vector<16x4xf32>
    %34 = arith.mulf %29, %33 : vector<16x4xf32>
    %35 = vector.broadcast %4 : vector<1x4xf32> to vector<16x4xf32>
    %36 = arith.mulf %11, %35 : vector<16x4xf32>
    %37 = vector.broadcast %5 : vector<1x4xf32> to vector<16x4xf32>
    %38 = arith.addf %36, %37 : vector<16x4xf32>
    %cst_16 = arith.constant 0.000000e+00 : f32
    %39 = vector.broadcast %cst_16 : f32 to vector<16x4xf32>
    %40 = arith.maximumf %38, %39 : vector<16x4xf32>
    %c3_i32 = arith.constant 3 : i32
    %41 = arith.cmpi slt, %arg1, %c3_i32 : i32
    %42 = arith.extui %41 : i1 to i32
    %43 = arith.sitofp %42 : i32 to f32
    %44 = vector.broadcast %43 : f32 to vector<16x4xf32>
    %45 = arith.mulf %40, %44 : vector<16x4xf32>
    %46 = tpu.concatenate %34, %23, %45 in 0 : vector<16x4xf32>, vector<64x4xf32>, vector<16x4xf32> -> vector<96x4xf32>
    %47 = tpu.iota {dimensions = array<i32: 0>} : vector<96x1xi32>
    %c16_i32 = arith.constant 16 : i32
    %c0_i32_17 = arith.constant 0 : i32
    %48 = arith.cmpi eq, %c16_i32, %c0_i32_17 : i32
    %c1_i32 = arith.constant 1 : i32
    %49 = arith.select %48, %c1_i32, %c16_i32 : i32
    %50 = vector.broadcast %49 : i32 to vector<96x1xi32>
    %51 = arith.remsi %47, %50 : vector<96x1xi32>
    %c0_i32_18 = arith.constant 0 : i32
    %52 = vector.broadcast %c0_i32_18 : i32 to vector<96x1xi32>
    %53 = arith.cmpi ne, %51, %52 : vector<96x1xi32>
    %c0_i32_19 = arith.constant 0 : i32
    %54 = vector.broadcast %c0_i32_19 : i32 to vector<96x1xi32>
    %55 = arith.cmpi slt, %51, %54 : vector<96x1xi32>
    %c0_i32_20 = arith.constant 0 : i32
    %56 = arith.cmpi slt, %49, %c0_i32_20 : i32
    %57 = vector.broadcast %56 : i1 to vector<96x1xi1>
    %58 = vector.broadcast %57 : vector<96x1xi1> to vector<96x1xi1>
    %59 = arith.xori %55, %58 : vector<96x1xi1>
    %60 = arith.andi %59, %53 : vector<96x1xi1>
    %61 = vector.broadcast %49 : i32 to vector<96x1xi32>
    %62 = arith.addi %51, %61 : vector<96x1xi32>
    %63 = arith.select %60, %62, %51 : vector<96x1xi1>, vector<96x1xi32>
    %c1_i32_21 = arith.constant 1 : i32
    %64 = tpu.dynamic_rotate %46 by %c1_i32_21 dim 0 : vector<96x4xf32>, i32 -> vector<96x4xf32>
    %c1_i32_22 = arith.constant 1 : i32
    %65 = vector.broadcast %c1_i32_22 : i32 to vector<96x1xi32>
    %66 = arith.cmpi sge, %63, %65 : vector<96x1xi32>
    %67 = arith.extui %66 : vector<96x1xi1> to vector<96x1xi32>
    %68 = arith.sitofp %67 : vector<96x1xi32> to vector<96x1xf32>
    %69 = vector.broadcast %68 : vector<96x1xf32> to vector<96x4xf32>
    %70 = arith.mulf %64, %69 : vector<96x4xf32>
    %c95_i32 = arith.constant 95 : i32
    %71 = tpu.dynamic_rotate %46 by %c95_i32 dim 0 : vector<96x4xf32>, i32 -> vector<96x4xf32>
    %c14_i32 = arith.constant 14 : i32
    %72 = vector.broadcast %c14_i32 : i32 to vector<96x1xi32>
    %73 = arith.cmpi sle, %63, %72 : vector<96x1xi32>
    %74 = arith.extui %73 : vector<96x1xi1> to vector<96x1xi32>
    %75 = arith.sitofp %74 : vector<96x1xi32> to vector<96x1xf32>
    %76 = vector.broadcast %75 : vector<96x1xf32> to vector<96x4xf32>
    %77 = arith.mulf %71, %76 : vector<96x4xf32>
    %c0_23 = arith.constant 0 : index
    %c0_24 = arith.constant 0 : index
    %c0_25 = arith.constant 0 : index
    %78 = vector.load %arg6[%c0_23, %c0_24, %c0_25] : memref<10x4x8xf32, #tpu.memory_space<vmem>>, vector<1x4x8xf32>
    %79 = vector.shape_cast %78 : vector<1x4x8xf32> to vector<4x8xf32>
    %cst_26 = arith.constant dense<0.000000e+00> : vector<64x8xf32>
    %80 = tpu.matmul %17, %79, %cst_26 {dimension_numbers = #tpu.dot_dimension_numbers<[1], [0], [0], [1], [0, 0, 1, 1], [], []>} : vector<64x4xf32>, vector<4x8xf32>, vector<64x8xf32> -> vector<64x8xf32>
    %81 = vector.extract_strided_slice %70 {offsets = [0, 0], sizes = [64, 4], strides = [1, 1]} : vector<96x4xf32> to vector<64x4xf32>
    %c1 = arith.constant 1 : index
    %c0_27 = arith.constant 0 : index
    %c0_28 = arith.constant 0 : index
    %82 = vector.load %arg6[%c1, %c0_27, %c0_28] : memref<10x4x8xf32, #tpu.memory_space<vmem>>, vector<1x4x8xf32>
    %83 = vector.shape_cast %82 : vector<1x4x8xf32> to vector<4x8xf32>
    %cst_29 = arith.constant dense<0.000000e+00> : vector<64x8xf32>
    %84 = tpu.matmul %81, %83, %cst_29 {dimension_numbers = #tpu.dot_dimension_numbers<[1], [0], [0], [1], [0, 0, 1, 1], [], []>} : vector<64x4xf32>, vector<4x8xf32>, vector<64x8xf32> -> vector<64x8xf32>
    %85 = arith.addf %80, %84 : vector<64x8xf32>
    %86 = vector.extract_strided_slice %46 {offsets = [0, 0], sizes = [64, 4], strides = [1, 1]} : vector<96x4xf32> to vector<64x4xf32>
    %c2 = arith.constant 2 : index
    %c0_30 = arith.constant 0 : index
    %c0_31 = arith.constant 0 : index
    %87 = vector.load %arg6[%c2, %c0_30, %c0_31] : memref<10x4x8xf32, #tpu.memory_space<vmem>>, vector<1x4x8xf32>
    %88 = vector.shape_cast %87 : vector<1x4x8xf32> to vector<4x8xf32>
    %cst_32 = arith.constant dense<0.000000e+00> : vector<64x8xf32>
    %89 = tpu.matmul %86, %88, %cst_32 {dimension_numbers = #tpu.dot_dimension_numbers<[1], [0], [0], [1], [0, 0, 1, 1], [], []>} : vector<64x4xf32>, vector<4x8xf32>, vector<64x8xf32> -> vector<64x8xf32>
    %90 = arith.addf %85, %89 : vector<64x8xf32>
    %91 = vector.extract_strided_slice %77 {offsets = [0, 0], sizes = [64, 4], strides = [1, 1]} : vector<96x4xf32> to vector<64x4xf32>
    %c3 = arith.constant 3 : index
    %c0_33 = arith.constant 0 : index
    %c0_34 = arith.constant 0 : index
    %92 = vector.load %arg6[%c3, %c0_33, %c0_34] : memref<10x4x8xf32, #tpu.memory_space<vmem>>, vector<1x4x8xf32>
    %93 = vector.shape_cast %92 : vector<1x4x8xf32> to vector<4x8xf32>
    %cst_35 = arith.constant dense<0.000000e+00> : vector<64x8xf32>
    %94 = tpu.matmul %91, %93, %cst_35 {dimension_numbers = #tpu.dot_dimension_numbers<[1], [0], [0], [1], [0, 0, 1, 1], [], []>} : vector<64x4xf32>, vector<4x8xf32>, vector<64x8xf32> -> vector<64x8xf32>
    %95 = arith.addf %90, %94 : vector<64x8xf32>
    %96 = vector.extract_strided_slice %70 {offsets = [16, 0], sizes = [64, 4], strides = [1, 1]} : vector<96x4xf32> to vector<64x4xf32>
    %c4 = arith.constant 4 : index
    %c0_36 = arith.constant 0 : index
    %c0_37 = arith.constant 0 : index
    %97 = vector.load %arg6[%c4, %c0_36, %c0_37] : memref<10x4x8xf32, #tpu.memory_space<vmem>>, vector<1x4x8xf32>
    %98 = vector.shape_cast %97 : vector<1x4x8xf32> to vector<4x8xf32>
    %cst_38 = arith.constant dense<0.000000e+00> : vector<64x8xf32>
    %99 = tpu.matmul %96, %98, %cst_38 {dimension_numbers = #tpu.dot_dimension_numbers<[1], [0], [0], [1], [0, 0, 1, 1], [], []>} : vector<64x4xf32>, vector<4x8xf32>, vector<64x8xf32> -> vector<64x8xf32>
    %100 = arith.addf %95, %99 : vector<64x8xf32>
    %101 = vector.extract_strided_slice %46 {offsets = [16, 0], sizes = [64, 4], strides = [1, 1]} : vector<96x4xf32> to vector<64x4xf32>
    %c5 = arith.constant 5 : index
    %c0_39 = arith.constant 0 : index
    %c0_40 = arith.constant 0 : index
    %102 = vector.load %arg6[%c5, %c0_39, %c0_40] : memref<10x4x8xf32, #tpu.memory_space<vmem>>, vector<1x4x8xf32>
    %103 = vector.shape_cast %102 : vector<1x4x8xf32> to vector<4x8xf32>
    %cst_41 = arith.constant dense<0.000000e+00> : vector<64x8xf32>
    %104 = tpu.matmul %101, %103, %cst_41 {dimension_numbers = #tpu.dot_dimension_numbers<[1], [0], [0], [1], [0, 0, 1, 1], [], []>} : vector<64x4xf32>, vector<4x8xf32>, vector<64x8xf32> -> vector<64x8xf32>
    %105 = arith.addf %100, %104 : vector<64x8xf32>
    %106 = vector.extract_strided_slice %77 {offsets = [16, 0], sizes = [64, 4], strides = [1, 1]} : vector<96x4xf32> to vector<64x4xf32>
    %c6 = arith.constant 6 : index
    %c0_42 = arith.constant 0 : index
    %c0_43 = arith.constant 0 : index
    %107 = vector.load %arg6[%c6, %c0_42, %c0_43] : memref<10x4x8xf32, #tpu.memory_space<vmem>>, vector<1x4x8xf32>
    %108 = vector.shape_cast %107 : vector<1x4x8xf32> to vector<4x8xf32>
    %cst_44 = arith.constant dense<0.000000e+00> : vector<64x8xf32>
    %109 = tpu.matmul %106, %108, %cst_44 {dimension_numbers = #tpu.dot_dimension_numbers<[1], [0], [0], [1], [0, 0, 1, 1], [], []>} : vector<64x4xf32>, vector<4x8xf32>, vector<64x8xf32> -> vector<64x8xf32>
    %110 = arith.addf %105, %109 : vector<64x8xf32>
    %111 = vector.extract_strided_slice %70 {offsets = [32, 0], sizes = [64, 4], strides = [1, 1]} : vector<96x4xf32> to vector<64x4xf32>
    %c7 = arith.constant 7 : index
    %c0_45 = arith.constant 0 : index
    %c0_46 = arith.constant 0 : index
    %112 = vector.load %arg6[%c7, %c0_45, %c0_46] : memref<10x4x8xf32, #tpu.memory_space<vmem>>, vector<1x4x8xf32>
    %113 = vector.shape_cast %112 : vector<1x4x8xf32> to vector<4x8xf32>
    %cst_47 = arith.constant dense<0.000000e+00> : vector<64x8xf32>
    %114 = tpu.matmul %111, %113, %cst_47 {dimension_numbers = #tpu.dot_dimension_numbers<[1], [0], [0], [1], [0, 0, 1, 1], [], []>} : vector<64x4xf32>, vector<4x8xf32>, vector<64x8xf32> -> vector<64x8xf32>
    %115 = arith.addf %110, %114 : vector<64x8xf32>
    %116 = vector.extract_strided_slice %46 {offsets = [32, 0], sizes = [64, 4], strides = [1, 1]} : vector<96x4xf32> to vector<64x4xf32>
    %c8 = arith.constant 8 : index
    %c0_48 = arith.constant 0 : index
    %c0_49 = arith.constant 0 : index
    %117 = vector.load %arg6[%c8, %c0_48, %c0_49] : memref<10x4x8xf32, #tpu.memory_space<vmem>>, vector<1x4x8xf32>
    %118 = vector.shape_cast %117 : vector<1x4x8xf32> to vector<4x8xf32>
    %cst_50 = arith.constant dense<0.000000e+00> : vector<64x8xf32>
    %119 = tpu.matmul %116, %118, %cst_50 {dimension_numbers = #tpu.dot_dimension_numbers<[1], [0], [0], [1], [0, 0, 1, 1], [], []>} : vector<64x4xf32>, vector<4x8xf32>, vector<64x8xf32> -> vector<64x8xf32>
    %120 = arith.addf %115, %119 : vector<64x8xf32>
    %121 = vector.extract_strided_slice %77 {offsets = [32, 0], sizes = [64, 4], strides = [1, 1]} : vector<96x4xf32> to vector<64x4xf32>
    %c9 = arith.constant 9 : index
    %c0_51 = arith.constant 0 : index
    %c0_52 = arith.constant 0 : index
    %122 = vector.load %arg6[%c9, %c0_51, %c0_52] : memref<10x4x8xf32, #tpu.memory_space<vmem>>, vector<1x4x8xf32>
    %123 = vector.shape_cast %122 : vector<1x4x8xf32> to vector<4x8xf32>
    %cst_53 = arith.constant dense<0.000000e+00> : vector<64x8xf32>
    %124 = tpu.matmul %121, %123, %cst_53 {dimension_numbers = #tpu.dot_dimension_numbers<[1], [0], [0], [1], [0, 0, 1, 1], [], []>} : vector<64x4xf32>, vector<4x8xf32>, vector<64x8xf32> -> vector<64x8xf32>
    %125 = arith.addf %120, %124 : vector<64x8xf32>
    %126 = vector.shape_cast %125 : vector<64x8xf32> to vector<1x4x16x8xf32>
    %c0_54 = arith.constant 0 : index
    %c0_55 = arith.constant 0 : index
    %c0_56 = arith.constant 0 : index
    %c0_57 = arith.constant 0 : index
    %127 = vector.load %arg7[%c0_54, %c0_55, %c0_56, %c0_57] : memref<1x4x16x8xf32, #tpu.memory_space<vmem>>, vector<1x4x16x8xf32>
    tpu.vector_store %arg7[%c0_54, %c0_55, %c0_56, %c0_57], %126 {strides = array<i32>} : memref<1x4x16x8xf32, #tpu.memory_space<vmem>>, vector<1x4x16x8xf32>,
    return
  }
  func.func @transform_0(%arg0: i32, %arg1: i32) -> (i32, i32, i32, i32) {
    %c0_i32 = arith.constant 0 : i32
    %c0_i32_0 = arith.constant 0 : i32
    %c0_i32_1 = arith.constant 0 : i32
    return %arg0, %arg1, %c0_i32, %c0_i32_0 : i32, i32, i32, i32
  }
  func.func @transform_1(%arg0: i32, %arg1: i32) -> (i32, i32, i32, i32) {
    %c4_i32 = arith.constant 4 : i32
    %0 = arith.muli %arg1, %c4_i32 : i32
    %c1_i32 = arith.constant 1 : i32
    %1 = arith.subi %0, %c1_i32 : i32
    %c0_i32 = arith.constant 0 : i32
    %2 = arith.maxsi %1, %c0_i32 : i32
    %c0_i32_0 = arith.constant 0 : i32
    %c0_i32_1 = arith.constant 0 : i32
    %c0_i32_2 = arith.constant 0 : i32
    return %arg0, %2, %c0_i32_0, %c0_i32_1 : i32, i32, i32, i32
  }
  func.func @transform_2(%arg0: i32, %arg1: i32) -> (i32, i32, i32, i32) {
    %c1_i32 = arith.constant 1 : i32
    %0 = arith.addi %arg1, %c1_i32 : i32
    %c4_i32 = arith.constant 4 : i32
    %1 = arith.muli %0, %c4_i32 : i32
    %c15_i32 = arith.constant 15 : i32
    %2 = arith.minsi %1, %c15_i32 : i32
    %c0_i32 = arith.constant 0 : i32
    %c0_i32_0 = arith.constant 0 : i32
    %c0_i32_1 = arith.constant 0 : i32
    return %arg0, %2, %c0_i32, %c0_i32_0 : i32, i32, i32, i32
  }
  func.func @transform_3(%arg0: i32, %arg1: i32) -> (i32, i32, i32) {
    %c0_i32 = arith.constant 0 : i32
    %c0_i32_0 = arith.constant 0 : i32
    %c0_i32_1 = arith.constant 0 : i32
    return %arg0, %c0_i32, %c0_i32_0 : i32, i32, i32
  }
  func.func @transform_4(%arg0: i32, %arg1: i32) -> (i32, i32, i32) {
    %c0_i32 = arith.constant 0 : i32
    %c0_i32_0 = arith.constant 0 : i32
    %c0_i32_1 = arith.constant 0 : i32
    %c0_i32_2 = arith.constant 0 : i32
    return %c0_i32, %c0_i32_0, %c0_i32_1 : i32, i32, i32
  }
  func.func @transform_5(%arg0: i32, %arg1: i32) -> (i32, i32, i32, i32) {
    %c0_i32 = arith.constant 0 : i32
    %c0_i32_0 = arith.constant 0 : i32
    %c0_i32_1 = arith.constant 0 : i32
    return %arg0, %arg1, %c0_i32, %c0_i32_0 : i32, i32, i32, i32
  }
}

</mosaic_0001>

<bundles_post_ra>
// kernel: tpu_custom_call.1
= control target key start
LH: loop header
LB: loop body
LE: loop exit
PB: predicated region body
PF: predicated region fallthrough
CT: control target
= control target key end

     0   :  { %s2773_s18 = smov 0   ;;  %s2775_s19 = smov 0   ;;  %s3405_s0 = inlined_call_operand.vmem [shape: f32[2,16,16,4], index: 0, kind: input, shape index: {}]   ;;  %s3406_s1 = inlined_call_operand.vmem [shape: f32[2,16,16,4], index: 1, kind: input, shape index: {}]   ;;  %s3407_s2 = inlined_call_operand.vmem [shape: f32[2,16,16,4], index: 2, kind: input, shape index: {}]   ;;  %s3408_s3 = inlined_call_operand.vmem [shape: f32[2,4,4], index: 3, kind: input, shape index: {}]   ;;  %s3409_s4 = inlined_call_operand.vmem [shape: f32[10,4,8], index: 4, kind: input, shape index: {}]   ;;  %s3410_s5 = inlined_call_operand.vmem [shape: f32[2,16,16,8], index: 5, kind: output, shape index: {}]  }
   0x1   :  { %s2777_s20 = smov 0   ;;  %s2779_s21 = smov 0  }
   0x2   :  { %s2781_s22 = smov 0  }
   0x3 LB: > { %s24_s23 = sadd.s32 1, %s2732_s20  ;;  %s27_s24 = sadd.s32 1, %s2736_s21  ;;  %s2740_s22 = sphi %s2781_s22, %s15_s22   ;;  %s2736_s21 = sphi %s2779_s21, %s3431_s21   ;;  %s2732_s20 = sphi %s2777_s20, %s3430_s20   ;;  %s2728_s19 = sphi %s2775_s19, %s3429_s19   ;;  %s2724_s18 = sphi %s2773_s18, %s3428_s18  }
   0x4   : > { %p25_p0 = scmp.ge.s32.totalorder %s24_s23, 4  ;;  %p2283_p1 = scmp.ge.s32.totalorder %s2740_s22, 1 }
   0x5   : > { %p282_p2 = scmp.lt.s32.totalorder %s2740_s22, 9 }
   0x6   : > { %s3433_s23 = smov (%p25_p0, %s24_s23), 0  ;;  %s3435_s24 = smov (!%p25_p0, %s27_s24), %s2736_s21 }
   0x7   : > { %p283_p3 = pnand %p2283_p1, %p282_p2  ;;  %p29_p4 = scmp.ge.s32.totalorder %s3435_s24, 2 }
   0x9   : > { %s3437_s24 = smov (%p29_p4, %s3435_s24), 0  ;;  %286 = sbr.rel (%p283_p3) target bundleno = 321 (0x141), region = 40 }
   0xe   : > { %v2322_v0 = vld [vmem:[%s3409_s4 + $0x4] sm:$0xf]  ;;  %vm842_vm0 = vcmask 1043456   ;;  %v814_v1 = vld [vmem:[%s3409_s4] sm:$0xf]  ;;  %s2814_s29 = sshll.u32 %s2724_s18, 2  ;;  %v423_v2 = vlaneseq }
   0xf   : > { %2521 = vmatprep.subr.msk.mxu0 %vm842_vm0, %v2322_v0  ;;  %2535 = vmatprep.subr.msk.mxu1 %vm842_vm0, %v814_v1  ;;  %p351_p5 = scmp.lt.s32.totalorder %s2728_s19, 1  ;;  %s2289_s30 = sadd.s32 4294967295, %s2814_s29  ;;  %v2823_v3 = vld [vmem:[%s3409_s4 + $0x8] sm:$0xf]  ;;  %v2832_v5 = vld [vmem:[%s3409_s4 + $0xc] sm:$0xf] }
  0x10   : > { %2522 = vmatpush3.msk.msra.mxu0 %vm842_vm0, %v2322_v0  ;;  %p363_p6 = scmp.gt.s32.totalorder %s2289_s30, 0  ;;  %p2290_p7 = scmp.lt.s32.totalorder %s2289_s30, 15  ;;  %v2826_v4 = vshrl.u32 %v423_v2, 7  ;;  %2536 = vmatpush3.msk.msra.mxu1 %vm842_vm0, %v814_v1  ;;  %vm817_vm3 = vcmask 31744   ;;  %v2742_v44 = vmov 0.0  }
  0x11   : > { %s3439_s19 = smov (!%p351_p5, %s2728_s19), 1  ;;  %2549 = vmatprep.subr.msk.mxu0 %vm842_vm0, %v2823_v3  ;;  %2563 = vmatprep.subr.msk.mxu1 %vm842_vm0, %v2832_v5  ;;  %s2430_s11 = sadd.s32 4, %s2814_s29 }
  0x12   : > { %s3441_s30 = smov (!%p363_p6, %s2289_s30), 0  ;;  %s2839_s10 = sshll.u32 %s3439_s19, 5  ;;  %v457_v6 = vsub.s32 2, %v2826_v4  ;;  %v469_v7 = vsub.s32 3, %v2826_v4  ;;  %v514_v17 = vadd.s32 16, %v2826_v4  ;;  %v516_v18 = vadd.s32 32, %v2826_v4 }
  0x13   : > { %s3443_s30 = smov (!%p2290_p7, %s3441_s30), 15  ;;  %p2843_p8 = scmp.lt.s32.totalorder %s2430_s11, 15  ;;  %v523_v19 = vadd.s32 88, %v2826_v4  ;;  %v528_v23 = vand.u32 15, %v2826_v4  ;;  %v518_v24 = vadd.s32 48, %v2826_v4  ;;  %v425_v29 = vsub.s32 0, %v2826_v4 }
  0x14   : > { %s2305_s13 = sshll.u32 %s3439_s19, 2  ;;  %s2295_s14 = sshll.u32 %s3443_s30, 1  ;;  %v542_v26 = vand.u32 15, %v514_v17  ;;  %v437_v30 = vsub.s32 1, %v2826_v4  ;;  %v556_v31 = vand.u32 15, %v516_v18  ;;  %vm680_vm1 = vcmp.lt.s32.totalorder %v2826_v4, 1 }
  0x15   : > { %s398_s17 = scalar_lea.vmem %s3408_s3, %s2305_s13  ;;  %s371_s25 = sadd.s32 %s2295_s14, %s2839_s10  ;;  %v605_v27 = vand.u32 15, %v523_v19  ;;  %v513_v34 = vadd.s32 8, %v2826_v4  ;;  %vm2900_vm2 = vcmp.ge.s32.totalorder %v528_v23, 1  ;;  %v570_v36 = vand.u32 15, %v518_v24 }
  0x16   : > { %v2852_v8 = vld [vmem:[%s398_s17] sm:$0xf]  ;;  %p493_p9 = scmp.gt.s32.totalorder %s2724_s18, 0  ;;  %s2297_s26 = sshll.u32 %s371_s25, 3  ;;  %v2905_v37 = vadd.s32 24, %v2826_v4  ;;  %v2908_v38 = vadd.s32 40, %v2826_v4 }
  0x17   : > { %v2856_v9 = vrot.slane %v2852_v8, %v457_v6  ;;  %s373_s19 = scalar_lea.vmem %s3406_s1, %s2297_s26  ;;  %v2862_v10 = vrot.slane %v2852_v8, %v469_v7  ;;  %s3445_s11 = smov (!%p2843_p8, %s2430_s11), 15  ;;  %vm695_vm4 = vcmp.ge.s32.totalorder %v542_v26, 1  ;;  %vm777_vm5 = vcmp.le.s32.totalorder %v605_v27, 14 }
  0x18   : > { %v419_v11 = vld [vmem:[%s373_s19] sm:$0xff]  ;;  %v420_v12 = vld [vmem:[%s373_s19 + $0x8] sm:$0xff]  ;;  %s494_s30 = scalar_select %p493_p9, 1, 0  ;;  %v2913_v41 = vrot.slane %v2852_v8, %v425_v29  ;;  %vm2920_vm6 = vcmp.ge.s32.totalorder %v556_v31, 1  ;;  %v2925_v45 = vsel %vm777_vm5, 1.0, %v2742_v44  ;;  %v2933_v50 = vrot.slane %v2852_v8, %v437_v30 }
  0x19   : > { %v487_v13 = vmul.f32 %v2856_v9, %v419_v11  ;;  %v488_v14 = vmul.f32 %v2856_v9, %v420_v12  ;;  %s3447_s11 = smov (!%p2843_p8, %s3445_s11), 15  ;;  %p505_p10 = scmp.lt.s32.totalorder %s2724_s18, 3  ;;  %v2310_v48 = vsel %vm2900_vm2, 1.0, %v2742_v44  ;;  %v535_v49 = vand.u32 15, %v513_v34 }
  0x1a   : > { %s495_s6 = scvt.s32.f32 %s494_s30  ;;  %s2302_s7 = sshll.u32 %s3447_s11, 1  ;;  %v2311_v51 = vsel %vm695_vm4, 1.0, %v2742_v44  ;;  %v549_v52 = vand.u32 15, %v2905_v37  ;;  %v563_v53 = vand.u32 15, %v2908_v38  ;;  %v2312_v59 = vsel %vm2920_vm6, 1.0, %v2742_v44 }
  0x1b   : > { %v489_v15 = vadd.f32 %v487_v13, %v2862_v10  ;;  %v490_v16 = vadd.f32 %v488_v14, %v2862_v10  ;;  %s388_s8 = sadd.s32 %s2302_s7, %s2839_s10  ;;  %p353_p11 = scmp.lt.s32.totalorder %s2814_s29, 15  ;;  %vm2958_vm7 = vcmp.ge.s32.totalorder %v570_v36, 1  ;;  %vm2983_vm8 = vcmp.le.s32.totalorder %v535_v49, 14 }
  0x1c   : > { %s2304_s9 = sshll.u32 %s388_s8, 3  ;;  %v496_v22 = vstv %s495_s6  ;;  %v2313_v30 = vsel %vm2958_vm7, 1.0, %v2742_v44  ;;  %vm753_vm9 = vcmp.lt.s32.totalorder %v2826_v4, 7  ;;  %vm3084_vm10 = vcmp.le.s32.totalorder %v549_v52, 14 }
  0x1d   : > { %v491_v20 = vmax.f32 %v489_v15, 0.0  ;;  %v492_v21 = vmax.f32 %v490_v16, 0.0  ;;  %s2883_s13 = scalar_lea.vmem %s3407_s2, %s2304_s9  ;;  %s3449_s29 = smov (!%p353_p11, %s2814_s29), 15  ;;  %vm771_vm11 = vcmp.le.s32.totalorder %v563_v53, 14 }
  0x1e   : > { %v422_v28 = vld [vmem:[%s2883_s13 + $0x8] sm:$0xff]  ;;  %s506_s14 = scalar_select %p505_p10, 1, 0  ;;  %v2318_v53 = vsel %vm771_vm11, 1.0, %v2742_v44 }
  0x1f   : > { %v2885_v25 = vmul.f32 %v496_v22, %v492_v21  ;;  %v2892_v32 = vmul.f32 %v496_v22, %v491_v20  ;;  %v500_v33 = vmul.f32 %v2856_v9, %v422_v28  ;;  %s2285_s18 = sshll.u32 %s3449_s29, 1 }
  0x20   : > { %s507_s15 = scvt.s32.f32 %s506_s14  ;;  %s2918_s16 = sadd.s32 %s2839_s10, %s2285_s18 }
  0x21   : > { %v502_v39 = vadd.f32 %v500_v33, %v2862_v10  ;;  %v669_v40 = vrot.slane %v2885_v25, 7  ;;  %v668_v47 = vrot.slane %v2892_v32, 7  ;;  %s2287_s29 = sshll.u32 %s2918_s16, 3 }
  0x22   : > { %v2915_v42 = vstv %s507_s15  ;;  %s2940_s25 = scalar_lea.vmem %s3405_s0, %s2287_s29  ;;  %s3370_s18 = scalar_lea.vmem %s3410_s5, %s2287_s29 }
  0x23   : > { %v504_v46 = vmax.f32 %v502_v39, 0.0  ;;  %v411_v55 = vld [vmem:[%s2940_s25] sm:$0xff]  ;;  %v691_v56 = vsel %vm680_vm1, %v668_v47, %v669_v40  ;;  %v412_v57 = vld [vmem:[%s2940_s25 + $0x8] sm:$0xff]  ;;  %v413_v58 = vld [vmem:[%s2940_s25 + $0x10] sm:$0xff] }
  0x24   : > { %v427_v61 = vmul.f32 %v2913_v41, %v411_v55  ;;  %v459_v62 = vmul.f32 %v2856_v9, %v411_v55  ;;  %v428_v63 = vmul.f32 %v2913_v41, %v412_v57  ;;  %v460_v0 = vmul.f32 %v2856_v9, %v412_v57  ;;  %v414_v1 = vld [vmem:[%s2940_s25 + $0x18] sm:$0xff]  ;;  %v415_v19 = vld [vmem:[%s2940_s25 + $0x20] sm:$0xff]  ;;  %v416_v26 = vld [vmem:[%s2940_s25 + $0x28] sm:$0xff] }
  0x25   : > { %v2946_v54 = vmul.f32 %v2915_v42, %v504_v46  ;;  %v429_v6 = vmul.f32 %v2913_v41, %v413_v58  ;;  %v461_v7 = vmul.f32 %v2856_v9, %v413_v58  ;;  %v430_v8 = vmul.f32 %v2913_v41, %v414_v1  ;;  %v417_v57 = vld [vmem:[%s2940_s25 + $0x30] sm:$0xff] }
  0x26   : > { %v439_v11 = vadd.f32 %v2933_v50, %v427_v61  ;;  %v471_v12 = vadd.f32 %v2862_v10, %v459_v62  ;;  %v440_v13 = vadd.f32 %v2933_v50, %v428_v63  ;;  %v472_v14 = vadd.f32 %v2862_v10, %v460_v0  ;;  %v3042_v61 = vld [vmem:[%s2940_s25 + $0x38] sm:$0xff] }
  0x27   : > { %v679_v2 = vrot.slane %v2946_v54, 7  ;;  %v441_v16 = vadd.f32 %v2933_v50, %v429_v6  ;;  %v473_v17 = vadd.f32 %v2862_v10, %v461_v7  ;;  %v442_v18 = vadd.f32 %v2933_v50, %v430_v8 }
  0x28   : > { %v447_v22 = vmax.f32 %v439_v11, 0.0  ;;  %v2987_v23 = vmax.f32 %v471_v12, 0.0  ;;  %v448_v24 = vmax.f32 %v440_v13, 0.0  ;;  %v2990_v27 = vmax.f32 %v472_v14, 0.0 }
  0x29   : > { %v692_v15 = vsel %vm680_vm1, %v679_v2, %v668_v47  ;;  %v449_v28 = vmax.f32 %v441_v16, 0.0  ;;  %v2992_v29 = vmax.f32 %v473_v17, 0.0  ;;  %v450_v33 = vmax.f32 %v442_v18, 0.0  ;;  %v3012_v47 = vld [vmem:[%s3409_s4 + $0x10] sm:$0xf] }
  0x2a   : > { %v729_v21 = vmul.f32 %v2310_v48, %v692_v15  ;;  %2537 = vmatprep.mubr.msk.f32.mxu1 %vm817_vm3, %v447_v22  ;;  %v670_v31 = vrot.slane %v2987_v23, 7  ;;  %v462_v34 = vmul.f32 %v2856_v9, %v414_v1  ;;  %v431_v35 = vmul.f32 %v2913_v41, %v415_v19  ;;  %v3017_v48 = vld [vmem:[%s3409_s4 + $0x14] sm:$0xf] }
  0x2b   : > { %2538 = vmatmul.mubr.msk.f32.vlgmr.msra.gmra.mxu1 %vm817_vm3, %v448_v24  ;;  %v671_v36 = vrot.slane %v2990_v27, 7  ;;  %v672_v39 = vrot.slane %v2992_v29, 7  ;;  %v463_v43 = vmul.f32 %v2856_v9, %v415_v19  ;;  %v432_v46 = vmul.f32 %v2913_v41, %v416_v26 }
  0x2c   : > { %2523 = vmatprep.mubr.msk.f32.mxu0 %vm817_vm3, %v729_v21  ;;  %2564 = vmatpush3.msk.msra.mxu1 %vm842_vm0, %v2832_v5  ;;  %v690_v49 = vsel %vm680_vm1, %v669_v40, %v670_v31  ;;  %v474_v55 = vadd.f32 %v2862_v10, %v462_v34  ;;  %v742_v58 = vrot.slane %v2885_v25, 1  ;;  %v743_v1 = vrot.slane %v2987_v23, 1 }
  0x2d   : > { %2524 = vmatmul.mubr.msk.f32.vlgmr.msra.gmra.mxu0 %vm817_vm3, %v691_v56  ;;  %v443_v56 = vadd.f32 %v2933_v50, %v431_v35  ;;  %v3031_v60 = vmul.f32 %v2311_v51, %v690_v49  ;;  %2540 = vmatprep.mubr.msk.f32.mxu1 %vm817_vm3, %v449_v28  ;;  %v688_v5 = vsel %vm680_vm1, %v671_v36, %v672_v39  ;;  %v741_v17 = vrot.slane %v2892_v32, 1 }
  0x2e   : > { %2550 = vmatpush3.msk.msra.mxu0 %vm842_vm0, %v2823_v3  ;;  %v3036_v3 = vsel %vm680_vm1, %v670_v31, %v671_v36  ;;  %v475_v40 = vadd.f32 %v2862_v10, %v463_v43  ;;  %v3044_v62 = vmax.f32 %v474_v55, 0.0  ;;  %v3046_v63 = vmul.f32 %v2312_v59, %v688_v5  ;;  %2591 = vmatprep.subr.msk.mxu1 %vm842_vm0, %v3017_v48  ;;  %v2381_v5 = vld [vmem:[%s3409_s4 + $0x18] sm:$0xf] }
  0x2f   : > { %v451_v0 = vmax.f32 %v443_v56, 0.0  ;;  %v444_v51 = vadd.f32 %v2933_v50, %v432_v46  ;;  %2577 = vmatprep.subr.msk.mxu0 %vm842_vm0, %v3012_v47  ;;  %2526 = vmatprep.mubr.msk.f32.mxu0 %vm817_vm3, %v3031_v60  ;;  %v464_v59 = vmul.f32 %v2856_v9, %v416_v26  ;;  %v433_v7 = vmul.f32 %v2913_v41, %v417_v57 }
  0x30   : > { %2541 = vmatmul.mubr.msk.f32.gmra.mxu1 %vm817_vm3, %v450_v33  ;;  %v3057_v6 = vmax.f32 %v475_v40, 0.0  ;;  %v673_v8 = vrot.slane %v3044_v62, 7  ;;  %v465_v12 = vmul.f32 %v2856_v9, %v417_v57  ;;  %v434_v13 = vmul.f32 %v2913_v41, %v3042_v61 }
  0x31   : > { %2527 = vmatmul.mubr.msk.f32.gmra.mxu0 %vm817_vm3, %v3036_v3  ;;  %2543 = vmatprep.mubr.msk.f32.mxu1 %vm817_vm3, %v451_v0  ;;  %v452_v11 = vmax.f32 %v444_v51, 0.0  ;;  %v476_v14 = vadd.f32 %v2862_v10, %v464_v59  ;;  %v445_v16 = vadd.f32 %v2933_v50, %v433_v7  ;;  %v2316_v41 = vsel %vm2983_vm8, 1.0, %v2742_v44  ;;  %v2391_v51 = vld [vmem:[%s3409_s4 + $0x1c] sm:$0xf] }
  0x32   : > { %2529 = vmatprep.mubr.msk.f32.mxu0 %vm817_vm3, %v3046_v63  ;;  %v674_v15 = vrot.slane %v3057_v6, 7  ;;  %v3076_v18 = vsel %vm680_vm1, %v672_v39, %v673_v8  ;;  %v446_v19 = vadd.f32 %v2933_v50, %v434_v13  ;;  %v744_v50 = vrot.slane %v2990_v27, 1 }
  0x33   : > { %v3088_v22 = vmax.f32 %v476_v14, 0.0  ;;  %v453_v26 = vmax.f32 %v445_v16, 0.0  ;;  %v477_v37 = vadd.f32 %v2862_v10, %v465_v12  ;;  %v763_v28 = vsel %vm753_vm9, %v742_v58, %v743_v1  ;;  %v421_v12 = vld [vmem:[%s2883_s13] sm:$0xff] }
  0x34   : > { %2544 = vmatmul.mubr.msk.f32.gmra.mxu1 %vm817_vm3, %v452_v11  ;;  %v686_v24 = vsel %vm680_vm1, %v673_v8, %v674_v15  ;;  %v454_v52 = vmax.f32 %v446_v19, 0.0  ;;  %v764_v33 = vsel %vm753_vm9, %v741_v17, %v742_v58  ;;  %v745_v34 = vrot.slane %v2992_v29, 1  ;;  %v2401_v16 = vld [vmem:[%s3409_s4 + $0x20] sm:$0xf] }
  0x35   : > { %2530 = vmatmul.mubr.msk.f32.gmra.mxu0 %vm817_vm3, %v3076_v18  ;;  %v3096_v20 = vmul.f32 %v2313_v30, %v686_v24  ;;  %2546 = vmatprep.mubr.msk.f32.mxu1 %vm817_vm3, %v453_v26  ;;  %v675_v31 = vrot.slane %v3088_v22, 7  ;;  %v519_v30 = vadd.s32 56, %v2826_v4  ;;  %v803_v36 = vmul.f32 %v2316_v41, %v763_v28 }
  0x36   : > { %v2317_v39 = vsel %vm3084_vm10, 1.0, %v2742_v44  ;;  %v3121_v43 = vmax.f32 %v477_v37, 0.0  ;;  %v761_v46 = vsel %vm753_vm9, %v744_v50, %v745_v34  ;;  %v746_v49 = vrot.slane %v3044_v62, 1 }
  0x37   : > { %2532 = vmatprep.mubr.msk.f32.mxu0 %vm817_vm3, %v3096_v20  ;;  %v3115_v35 = vsel %vm680_vm1, %v674_v15, %v675_v31  ;;  %v747_v55 = vrot.slane %v3057_v6, 1  ;;  %v577_v56 = vand.u32 15, %v519_v30  ;;  %v3137_v57 = vsel %vm753_vm9, %v743_v1, %v744_v50 }
  0x38   : > { %2547 = vmatmul.mubr.msk.f32.gmra.mxu1 %vm817_vm3, %v454_v52  ;;  %v3139_v58 = vmul.f32 %v2317_v39, %v761_v46  ;;  %v748_v40 = vrot.slane %v3088_v22, 1  ;;  %v749_v0 = vrot.slane %v3121_v43, 1  ;;  %v520_v8 = vadd.s32 64, %v2826_v4 }
  0x39   : > { %2533 = vmatmul.mubr.msk.f32.gmra.mxu0 %vm817_vm3, %v3115_v35  ;;  %2565 = vmatprep.mubr.msk.f32.mxu1 %vm817_vm3, %v764_v33  ;;  %v759_v38 = vsel %vm753_vm9, %v746_v49, %v747_v55  ;;  %vm773_vm12 = vcmp.le.s32.totalorder %v577_v56, 14  ;;  %v466_v11 = vmul.f32 %v2856_v9, %v3042_v61  ;;  %v499_v14 = vmul.f32 %v2856_v9, %v421_v12  ;;  %v2411_v9 = vld [vmem:[%s3409_s4 + $0x24] sm:$0xf] }
  0x3a   : > { %2551 = vmatprep.mubr.msk.f32.mxu0 %vm817_vm3, %v2892_v32  ;;  %v2319_v1 = vsel %vm773_vm12, 1.0, %v2742_v44  ;;  %v3185_v59 = vsel %vm753_vm9, %v747_v55, %v748_v40  ;;  %v584_v13 = vand.u32 15, %v520_v8  ;;  %v676_v61 = vrot.slane %v3121_v43, 7 }
  0x3b   : > { %v478_v15 = vadd.f32 %v2862_v10, %v466_v11  ;;  %v522_v21 = vadd.s32 80, %v2826_v4  ;;  %v521_v37 = vadd.s32 72, %v2826_v4 }
  0x3c   : > { %2566 = vmatmul.mubr.msk.f32.vlgmr.msra.gmra.mxu1 %vm817_vm3, %v803_v36  ;;  %vm701_vm13 = vcmp.ge.s32.totalorder %v584_v13, 1 }
  0x3d   : > { %2552 = vmatmul.mubr.msk.f32.vlgmr.msra.gmra.mxu0 %vm817_vm3, %v2885_v25  ;;  %2592 = vmatpush3.msk.msra.mxu1 %vm842_vm0, %v3017_v48  ;;  %v3162_v25 = vsel %vm753_vm9, %v745_v34, %v746_v49  ;;  %v3169_v48 = vmul.f32 %v2318_v53, %v759_v38  ;;  %v598_v50 = vand.u32 15, %v522_v21  ;;  %v591_v52 = vand.u32 15, %v521_v37 }
  0x3e   : > { %2578 = vmatpush3.msk.msra.mxu0 %vm842_vm0, %v3012_v47  ;;  %2554 = vmatprep.mubr.msk.f32.mxu0 %vm817_vm3, %v2987_v23  ;;  %v757_v47 = vsel %vm753_vm9, %v748_v40, %v749_v0 }
  0x3f   : > { %2568 = vmatprep.mubr.msk.f32.mxu1 %vm817_vm3, %v3137_v57  ;;  %2605 = vmatprep.subr.msk.mxu0 %vm842_vm0, %v2381_v5  ;;  %v3189_v7 = vmul.f32 %v2319_v1, %v757_v47  ;;  %vm703_vm14 = vcmp.ge.s32.totalorder %v598_v50, 1  ;;  %vm775_vm15 = vcmp.le.s32.totalorder %v591_v52, 14 }
  0x40   : > { %2569 = vmatmul.mubr.msk.f32.gmra.mxu1 %vm817_vm3, %v3139_v58  ;;  %2619 = vmatprep.subr.msk.mxu1 %vm842_vm0, %v2391_v51  ;;  %v2320_v30 = vsel %vm775_vm15, 1.0, %v2742_v44 }
  0x41   : > { %2555 = vmatmul.mubr.msk.f32.gmra.mxu0 %vm817_vm3, %v2990_v27  ;;  %2571 = vmatprep.mubr.msk.f32.mxu1 %vm817_vm3, %v3162_v25 }
  0x42   : > { %2557 = vmatprep.mubr.msk.f32.mxu0 %vm817_vm3, %v2992_v29 }
  0x44   : > { %2572 = vmatmul.mubr.msk.f32.gmra.mxu1 %vm817_vm3, %v3169_v48 }
  0x45   : > { %2558 = vmatmul.mubr.msk.f32.gmra.mxu0 %vm817_vm3, %v3044_v62  ;;  %2574 = vmatprep.mubr.msk.f32.mxu1 %vm817_vm3, %v3185_v59 }
  0x46   : > { %2560 = vmatprep.mubr.msk.f32.mxu0 %vm817_vm3, %v3057_v6 }
  0x48   : > { %2575 = vmatmul.mubr.msk.f32.gmra.mxu1 %vm817_vm3, %v3189_v7 }
  0x49   : > { %2561 = vmatmul.mubr.msk.f32.gmra.mxu0 %vm817_vm3, %v3088_v22  ;;  %2593 = vmatprep.mubr.msk.f32.mxu1 %vm817_vm3, %v2987_v23  ;;  %v501_v23 = vadd.f32 %v499_v14, %v2862_v10 }
  0x4a   : > { %2579 = vmatprep.mubr.msk.f32.mxu0 %vm817_vm3, %v3031_v60  ;;  %v3224_v60 = vmax.f32 %v478_v15, 0.0 }
  0x4b   : > { %v503_v10 = vmax.f32 %v501_v23, 0.0 }
  0x4c   : > { %2594 = vmatmul.mubr.msk.f32.vlgmr.msra.gmra.mxu1 %vm817_vm3, %v2990_v27  ;;  %v684_v27 = vsel %vm680_vm1, %v675_v31, %v676_v61  ;;  %v677_v41 = vrot.slane %v3224_v60, 7  ;;  %v2315_v31 = vsel %vm703_vm14, 1.0, %v2742_v44 }
  0x4d   : > { %2580 = vmatmul.mubr.msk.f32.vlgmr.msra.gmra.mxu0 %vm817_vm3, %v3036_v3  ;;  %2620 = vmatpush3.msk.msra.mxu1 %vm842_vm0, %v2391_v51  ;;  %v2314_v3 = vsel %vm701_vm13, 1.0, %v2742_v44  ;;  %v509_v24 = vmul.f32 %v2915_v42, %v503_v10  ;;  %v752_v44 = vrot.slane %v2946_v54, 1 }
  0x4e   : > { %2606 = vmatpush3.msk.msra.mxu0 %vm842_vm0, %v2381_v5  ;;  %2582 = vmatprep.mubr.msk.f32.mxu0 %vm817_vm3, %v3046_v63  ;;  %v737_v19 = vmul.f32 %v2314_v3, %v684_v27  ;;  %v683_v26 = vsel %vm680_vm1, %v676_v61, %v677_v41 }
  0x4f   : > { %2596 = vmatprep.mubr.msk.f32.mxu1 %vm817_vm3, %v2992_v29  ;;  %2633 = vmatprep.subr.msk.mxu0 %vm842_vm0, %v2401_v16  ;;  %v678_v42 = vrot.slane %v509_v24, 7  ;;  %v751_v33 = vrot.slane %v509_v24, 1 }
  0x50   : > { %2597 = vmatmul.mubr.msk.f32.gmra.mxu1 %vm817_vm3, %v3044_v62  ;;  %2647 = vmatprep.subr.msk.mxu1 %vm842_vm0, %v2411_v9 }
  0x51   : > { %2583 = vmatmul.mubr.msk.f32.gmra.mxu0 %vm817_vm3, %v3076_v18  ;;  %2599 = vmatprep.mubr.msk.f32.mxu1 %vm817_vm3, %v3057_v6  ;;  %v682_v28 = vsel %vm680_vm1, %v677_v41, %v678_v42  ;;  %v681_v36 = vsel %vm680_vm1, %v678_v42, %v679_v2  ;;  %v765_v2 = vsel %vm753_vm9, %v752_v44, %v741_v17 }
  0x52   : > { %2585 = vmatprep.mubr.msk.f32.mxu0 %vm817_vm3, %v3096_v20 }
  0x54   : > { %2600 = vmatmul.mubr.msk.f32.gmra.mxu1 %vm817_vm3, %v3088_v22 }
  0x55   : > { %2586 = vmatmul.mubr.msk.f32.gmra.mxu0 %vm817_vm3, %v3115_v35  ;;  %2602 = vmatprep.mubr.msk.f32.mxu1 %vm817_vm3, %v3121_v43 }
  0x56   : > { %2588 = vmatprep.mubr.msk.f32.mxu0 %vm817_vm3, %v737_v19 }
  0x58   : > { %2603 = vmatmul.mubr.msk.f32.gmra.mxu1 %vm817_vm3, %v3224_v60 }
  0x59   : > { %2589 = vmatmul.mubr.msk.f32.gmra.mxu0 %vm817_vm3, %v683_v26  ;;  %2621 = vmatprep.mubr.msk.f32.mxu1 %vm817_vm3, %v3046_v63  ;;  %v750_v63 = vrot.slane %v3224_v60, 1 }
  0x5a   : > { %2607 = vmatprep.mubr.msk.f32.mxu0 %vm817_vm3, %v3137_v57 }
  0x5b   : > { %v755_v34 = vsel %vm753_vm9, %v750_v63, %v751_v33 }
  0x5c   : > { %2622 = vmatmul.mubr.msk.f32.vlgmr.msra.gmra.mxu1 %vm817_vm3, %v3076_v18  ;;  %v739_v18 = vmul.f32 %v2315_v31, %v682_v28 }
  0x5d   : > { %2608 = vmatmul.mubr.msk.f32.vlgmr.msra.gmra.mxu0 %vm817_vm3, %v3139_v58  ;;  %2648 = vmatpush3.msk.msra.mxu1 %vm842_vm0, %v2411_v9 }
  0x5e   : > { %2634 = vmatpush3.msk.msra.mxu0 %vm842_vm0, %v2401_v16  ;;  %2610 = vmatprep.mubr.msk.f32.mxu0 %vm817_vm3, %v3162_v25  ;;  %vm2111_vm0 = vcmask 64512  }
  0x5f   : > { %2624 = vmatprep.mubr.msk.f32.mxu1 %vm817_vm3, %v3096_v20  ;;  %v756_v20 = vsel %vm753_vm9, %v749_v0, %v750_v63 }
  0x60   : > { %2625 = vmatmul.mubr.msk.f32.gmra.mxu1 %vm817_vm3, %v3115_v35  ;;  %v811_v35 = vmul.f32 %v2320_v30, %v755_v34 }
  0x61   : > { %2611 = vmatmul.mubr.msk.f32.gmra.mxu0 %vm817_vm3, %v3169_v48  ;;  %2627 = vmatprep.mubr.msk.f32.mxu1 %vm817_vm3, %v737_v19 }
  0x62   : > { %2613 = vmatprep.mubr.msk.f32.mxu0 %vm817_vm3, %v3185_v59 }
  0x64   : > { %2628 = vmatmul.mubr.msk.f32.gmra.mxu1 %vm817_vm3, %v683_v26 }
  0x65   : > { %2614 = vmatmul.mubr.msk.f32.gmra.mxu0 %vm817_vm3, %v3189_v7  ;;  %2630 = vmatprep.mubr.msk.f32.mxu1 %vm817_vm3, %v739_v18 }
  0x66   : > { %2616 = vmatprep.mubr.msk.f32.mxu0 %vm817_vm3, %v756_v20 }
  0x68   : > { %2631 = vmatmul.mubr.msk.f32.gmra.mxu1 %vm817_vm3, %v681_v36 }
  0x69   : > { %2617 = vmatmul.mubr.msk.f32.gmra.mxu0 %vm817_vm3, %v811_v35  ;;  %2649 = vmatprep.mubr.msk.f32.mxu1 %vm817_vm3, %v3162_v25 }
  0x6a   : > { %2635 = vmatprep.mubr.msk.f32.mxu0 %vm817_vm3, %v2992_v29  ;;  %v754_v29 = vsel %vm753_vm9, %v751_v33, %v752_v44 }
  0x6c   : > { %2650 = vmatmul.mubr.msk.f32.vlgmr.msra.gmra.mxu1 %vm817_vm3, %v3169_v48 }
  0x6d   : > { %2636 = vmatmul.mubr.msk.f32.vlgmr.msra.gmra.mxu0 %vm817_vm3, %v3044_v62  ;;  %2652 = vmatprep.mubr.msk.f32.mxu1 %vm817_vm3, %v3185_v59  ;;  %v813_v62 = vmul.f32 %v2925_v45, %v765_v2 }
  0x6e   : > { %2638 = vmatprep.mubr.msk.f32.mxu0 %vm817_vm3, %v3057_v6 }
  0x70   : > { %2653 = vmatmul.mubr.msk.f32.gmra.mxu1 %vm817_vm3, %v3189_v7 }
  0x71   : > { %2639 = vmatmul.mubr.msk.f32.gmra.mxu0 %vm817_vm3, %v3088_v22  ;;  %2655 = vmatprep.mubr.msk.f32.mxu1 %vm817_vm3, %v756_v20 }
  0x72   : > { %2641 = vmatprep.mubr.msk.f32.mxu0 %vm817_vm3, %v3121_v43 }
  0x74   : > { %2656 = vmatmul.mubr.msk.f32.gmra.mxu1 %vm817_vm3, %v811_v35 }
  0x75   : > { %2642 = vmatmul.mubr.msk.f32.gmra.mxu0 %vm817_vm3, %v3224_v60  ;;  %2658 = vmatprep.mubr.msk.f32.mxu1 %vm817_vm3, %v754_v29 }
  0x76   : > { %2644 = vmatprep.mubr.msk.f32.mxu0 %vm817_vm3, %v509_v24 }
  0x78   : > { %2659 = vmatmul.mubr.msk.f32.gmra.mxu1 %vm817_vm3, %v813_v62 }
  0x79   : > { %2645 = vmatmul.mubr.msk.f32.gmra.mxu0 %vm817_vm3, %v2946_v54 }
  0xeb   : > { %v2539_v6 = vpop.f32.mrf.mxu1 }
  0xed   : > { %v2525_v32 = vpop.f32.mrf.mxu0  ;;  %v1044_v17 = vpop.f32.mrf.mxu1 }
  0xee   : > { %v1050_v50 = vadd.f32 %v2539_v6, %v2525_v32 }
  0xef   : > { %v912_v4 = vpop.f32.mrf.mxu0 }
  0xf0   : > { %v2542_v22 = vpop.f32.mrf.mxu1  ;;  %v1045_v52 = vadd.f32 %v1044_v17, %v912_v4 }
  0xf1   : > { %v2528_v39 = vpop.f32.mrf.mxu0 }
  0xf2   : > { %v1054_v43 = vpop.f32.mrf.mxu1  ;;  %v1060_v33 = vadd.f32 %v2542_v22, %v2528_v39 }
  0xf3   : > { %v922_v45 = vpop.f32.mrf.mxu0 }
  0xf4   : > { %v2545_v46 = vpop.f32.mrf.mxu1  ;;  %v1055_v20 = vadd.f32 %v1054_v43, %v922_v45 }
  0xf5   : > { %v2531_v49 = vpop.f32.mrf.mxu0 }
  0xf6   : > { %v1064_v55 = vpop.f32.mrf.mxu1  ;;  %v1070_v29 = vadd.f32 %v2545_v46, %v2531_v49 }
  0xf7   : > { %v932_v56 = vpop.f32.mrf.mxu0 }
  0xf8   : > { %v2548_v57 = vpop.f32.mrf.mxu1 }
  0xf9   : > { %v2534_v58 = vpop.f32.mrf.mxu0 }
  0xfa   : > { %v3340_v5 = vpop.f32.mrf.mxu1  ;;  %v1080_v22 = vadd.f32 %v2548_v57, %v2534_v58 }
  0xfb   : > { %v3342_v38 = vpop.f32.mrf.mxu0 }
  0xfc   : > { %v2567_v53 = vpop.f32.mrf.mxu1  ;;  %v1075_v46 = vadd.f32 %v3340_v5, %v3342_v38 }
  0xfd   : > { %v2553_v54 = vpop.f32.mrf.mxu0 }
  0xfe   : > { %v1320_v40 = vpop.f32.mrf.mxu1  ;;  %v1218_v63 = vadd.f32 %v2553_v54, %v1050_v50 }
  0xff   : > { %v1178_v0 = vpop.f32.mrf.mxu0 }
 0x100   : > { %v2570_v51 = vpop.f32.mrf.mxu1  ;;  %v1217_v18 = vadd.f32 %v1178_v0, %v1045_v52  ;;  %v1360_v35 = vadd.f32 %v2567_v53, %v1218_v63 }
 0x101   : > { %v2556_v25 = vpop.f32.mrf.mxu0 }
 0x102   : > { %v1330_v48 = vpop.f32.mrf.mxu1  ;;  %v1220_v36 = vadd.f32 %v2556_v25, %v1060_v33  ;;  %v1359_v62 = vadd.f32 %v1320_v40, %v1217_v18 }
 0x103   : > { %v1188_v47 = vpop.f32.mrf.mxu0 }
 0x104   : > { %v2573_v1 = vpop.f32.mrf.mxu1  ;;  %v1219_v32 = vadd.f32 %v1188_v47, %v1055_v20  ;;  %v1362_v4 = vadd.f32 %v2570_v51, %v1220_v36 }
 0x105   : > { %v2559_v59 = vpop.f32.mrf.mxu0 }
 0x106   : > { %v1340_v7 = vpop.f32.mrf.mxu1  ;;  %v1222_v17 = vadd.f32 %v2559_v59, %v1070_v29  ;;  %v1361_v52 = vadd.f32 %v1330_v48, %v1219_v32 }
 0x107   : > { %v1198_v8 = vpop.f32.mrf.mxu0 }
 0x108   : > { %v3344_v11 = vpop.f32.mrf.mxu1  ;;  %v1364_v25 = vadd.f32 %v2573_v1, %v1222_v17 }
 0x109   : > { %v2562_v12 = vpop.f32.mrf.mxu0 }
 0x10a   : > { %v3346_v13 = vpop.f32.mrf.mxu1  ;;  %v1224_v49 = vadd.f32 %v2562_v12, %v1080_v22 }
 0x10b   : > { %v1208_v14 = vpop.f32.mrf.mxu0 }
 0x10c   : > { %v2595_v15 = vpop.f32.mrf.mxu1 }
 0x10d   : > { %v2581_v61 = vpop.f32.mrf.mxu0 }
 0x10e   : > { %v1568_v16 = vpop.f32.mrf.mxu1  ;;  %v1484_v6 = vadd.f32 %v2581_v61, %v1360_v35  ;;  %v1223_v61 = vadd.f32 %v1208_v14, %v1075_v46 }
 0x10f   : > { %v1444_v9 = vpop.f32.mrf.mxu0 }
 0x110   : > { %v2598_v23 = vpop.f32.mrf.mxu1  ;;  %v1483_v54 = vadd.f32 %v1444_v9, %v1359_v62  ;;  %v1608_v43 = vadd.f32 %v2595_v15, %v1484_v6  ;;  %v1366_v15 = vadd.f32 %v3344_v11, %v1224_v49 }
 0x111   : > { %v2584_v60 = vpop.f32.mrf.mxu0 }
 0x112   : > { %v1578_v27 = vpop.f32.mrf.mxu1  ;;  %v1486_v45 = vadd.f32 %v2584_v60, %v1362_v4  ;;  %v1607_v47 = vadd.f32 %v1568_v16, %v1483_v54  ;;  %v1365_v16 = vadd.f32 %v3346_v13, %v1223_v61 }
 0x113   : > { %v1454_v3 = vpop.f32.mrf.mxu0 }
 0x114   : > { %v3348_v10 = vpop.f32.mrf.mxu1  ;;  %v1610_v57 = vadd.f32 %v2598_v23, %v1486_v45 }
 0x115   : > { %v2587_v19 = vpop.f32.mrf.mxu0 }
 0x116   : > { %v3350_v41 = vpop.f32.mrf.mxu1  ;;  %v1488_v58 = vadd.f32 %v2587_v19, %v1364_v25 }
 0x117   : > { %v1464_v21 = vpop.f32.mrf.mxu0 }
 0x118   : > { %v3352_v24 = vpop.f32.mrf.mxu1 }
 0x119   : > { %3422 = vst [vmem:[#allocation2_spill] sm:$0xff] %v3352_v24  ;;  %v2590_v26 = vpop.f32.mrf.mxu0  ;;  %v1065_v24 = vadd.f32 %v1064_v55, %v932_v56  ;;  %v1485_v55 = vadd.f32 %v1454_v3, %v1361_v52 }
 0x11a   : > { %v3354_v37 = vpop.f32.mrf.mxu1  ;;  %v1490_v3 = vadd.f32 %v2590_v26, %v1366_v15 }
 0x11b   : > { %3423 = vst [vmem:[#allocation3_spill] sm:$0xff] %v3354_v37  ;;  %v3356_v42 = vpop.f32.mrf.mxu0  ;;  %v1221_v39 = vadd.f32 %v1198_v8, %v1065_v24  ;;  %v1609_v5 = vadd.f32 %v1578_v27, %v1485_v55 }
 0x11c   : > { %3424 = vst [vmem:[#allocation4_spill] sm:$0xff] %v3356_v42  ;;  %v2623_v28 = vpop.f32.mrf.mxu1 }
 0x11d   : > { %v2609_v31 = vpop.f32.mrf.mxu0  ;;  %v1363_v59 = vadd.f32 %v1340_v7, %v1221_v39  ;;  %v1612_v7 = vadd.f32 %v3348_v10, %v1488_v58 }
 0x11e   : > { %v1816_v34 = vpop.f32.mrf.mxu1  ;;  %v1732_v56 = vadd.f32 %v2609_v31, %v1608_v43 }
 0x11f   : > { %v1692_v30 = vpop.f32.mrf.mxu0  ;;  %v1487_v60 = vadd.f32 %v1464_v21, %v1363_v59 }
 0x120   : > { %v2626_v44 = vpop.f32.mrf.mxu1  ;;  %v1731_v8 = vadd.f32 %v1692_v30, %v1607_v47  ;;  %v1856_v38 = vadd.f32 %v2623_v28, %v1732_v56  ;;  %v3426_v18 = vld [vmem:[#allocation2_spill] sm:$0xff] }
 0x121   : > { %v2612_v2 = vpop.f32.mrf.mxu0  ;;  %v1611_v33 = vadd.f32 %v3350_v41, %v1487_v60 }
 0x122   : > { %v1826_v37 = vpop.f32.mrf.mxu1  ;;  %v1734_v12 = vadd.f32 %v2612_v2, %v1610_v57  ;;  %v1855_v14 = vadd.f32 %v1816_v34, %v1731_v8  ;;  %v1614_v34 = vadd.f32 %v3426_v18, %v1490_v3  ;;  %v3427_v29 = vld [vmem:[#allocation3_spill] sm:$0xff] }
 0x123   : > { %v1702_v42 = vpop.f32.mrf.mxu0  ;;  %v3425_v11 = vld [vmem:[#allocation4_spill] sm:$0xff] }
 0x124   : > { %v2629_v50 = vpop.f32.mrf.mxu1  ;;  %v1733_v23 = vadd.f32 %v1702_v42, %v1609_v5  ;;  %v1489_v21 = vadd.f32 %v3425_v11, %v1365_v16  ;;  %v1858_v27 = vadd.f32 %v2626_v44, %v1734_v12 }
 0x125   : > { %v2615_v0 = vpop.f32.mrf.mxu0 }
 0x126   : > { %v1836_v53 = vpop.f32.mrf.mxu1  ;;  %v1736_v26 = vadd.f32 %v2615_v0, %v1612_v7  ;;  %v1857_v30 = vadd.f32 %v1826_v37, %v1733_v23  ;;  %v1613_v62 = vadd.f32 %v3427_v29, %v1489_v21 }
 0x127   : > { %v1712_v40 = vpop.f32.mrf.mxu0 }
 0x128   : > { %v2632_v51 = vpop.f32.mrf.mxu1  ;;  %v1735_v20 = vadd.f32 %v1712_v40, %v1611_v33  ;;  %v1860_v44 = vadd.f32 %v2629_v50, %v1736_v26 }
 0x129   : > { %v2618_v9 = vpop.f32.mrf.mxu0 }
 0x12a   : > { %v1846_v48 = vpop.f32.mrf.mxu1  ;;  %v1738_v6 = vadd.f32 %v2618_v9, %v1614_v34  ;;  %v1859_v22 = vadd.f32 %v1836_v53, %v1735_v20 }
 0x12b   : > { %v1722_v24 = vpop.f32.mrf.mxu0 }
 0x12c   : > { %v2651_v1 = vpop.f32.mrf.mxu1  ;;  %v1737_v39 = vadd.f32 %v1722_v24, %v1613_v62  ;;  %v1862_v46 = vadd.f32 %v2632_v51, %v1738_v6 }
 0x12d   : > { %v2637_v63 = vpop.f32.mrf.mxu0 }
 0x12e   : > { %v1980_v19 = vadd.f32 %v2637_v63, %v1856_v38  ;;  %v2064_v31 = vpop.f32.mrf.mxu1  ;;  %v1861_v47 = vadd.f32 %v1846_v48, %v1737_v39 }
 0x12f   : > { %v1940_v13 = vpop.f32.mrf.mxu0 }
 0x130   : > { %v2104_v10 = vadd.f32 %v2651_v1, %v1980_v19  ;;  %v1979_v42 = vadd.f32 %v1940_v13, %v1855_v14  ;;  %v2654_v28 = vpop.f32.mrf.mxu1 }
 0x131   : > { %v2640_v41 = vpop.f32.mrf.mxu0 }
 0x132   : > { %2113 = vst.msk [vmem:[%s3370_s18 + $0x8] sm:$0xff] %vm2111_vm0, %v2104_v10  ;;  %v2103_v35 = vadd.f32 %v2064_v31, %v1979_v42  ;;  %v1982_v36 = vadd.f32 %v2640_v41, %v1858_v27  ;;  %v2074_v2 = vpop.f32.mrf.mxu1 }
 0x133   : > { %v1950_v32 = vpop.f32.mrf.mxu0 }
 0x134   : > { %2112 = vst.msk [vmem:[%s3370_s18] sm:$0xff] %vm2111_vm0, %v2103_v35  ;;  %v2106_v4 = vadd.f32 %v2654_v28, %v1982_v36  ;;  %v1981_v17 = vadd.f32 %v1950_v32, %v1857_v30  ;;  %v2657_v54 = vpop.f32.mrf.mxu1 }
 0x135   : > { %v2643_v37 = vpop.f32.mrf.mxu0 }
 0x136   : > { %2115 = vst.msk [vmem:[%s3370_s18 + $0x18] sm:$0xff] %vm2111_vm0, %v2106_v4  ;;  %v2105_v0 = vadd.f32 %v2074_v2, %v1981_v17  ;;  %v1984_v52 = vadd.f32 %v2643_v37, %v1860_v44  ;;  %v2084_v43 = vpop.f32.mrf.mxu1 }
 0x137   : > { %v1960_v45 = vpop.f32.mrf.mxu0 }
 0x138   : > { %2114 = vst.msk [vmem:[%s3370_s18 + $0x10] sm:$0xff] %vm2111_vm0, %v2105_v0  ;;  %v2108_v50 = vadd.f32 %v2657_v54, %v1984_v52  ;;  %v1983_v49 = vadd.f32 %v1960_v45, %v1859_v22  ;;  %v2660_v25 = vpop.f32.mrf.mxu1 }
 0x139   : > { %v2646_v40 = vpop.f32.mrf.mxu0 }
 0x13a   : > { %2117 = vst.msk [vmem:[%s3370_s18 + $0x28] sm:$0xff] %vm2111_vm0, %v2108_v50  ;;  %v2107_v53 = vadd.f32 %v2084_v43, %v1983_v49  ;;  %v1986_v55 = vadd.f32 %v2646_v40, %v1862_v46  ;;  %v2094_v9 = vpop.f32.mrf.mxu1 }
 0x13b   : > { %v1970_v56 = vpop.f32.mrf.mxu0 }
 0x13c   : > { %2116 = vst.msk [vmem:[%s3370_s18 + $0x20] sm:$0xff] %vm2111_vm0, %v2107_v53  ;;  %v2110_v59 = vadd.f32 %v2660_v25, %v1986_v55  ;;  %v1985_v61 = vadd.f32 %v1970_v56, %v1861_v47 }
 0x13e   : > { %2119 = vst.msk [vmem:[%s3370_s18 + $0x38] sm:$0xff] %vm2111_vm0, %v2110_v59  ;;  %v2109_v51 = vadd.f32 %v2094_v9, %v1985_v61 }
 0x140   : > { %2118 = vst.msk [vmem:[%s3370_s18 + $0x30] sm:$0xff] %vm2111_vm0, %v2109_v51 }
 0x141 PF: > { %s15_s22 = sadd.s32 1, %s2740_s22   ;;  %s3428_s18 = smov %s2732_s20 }
 0x142   : > { %p12_p12 = scmp.ge.s32.totalorder %s15_s22, 10   ;;  %s3429_s19 = smov %s2736_s21 }
 0x143   : > { %s3430_s20 = smov %s3433_s23  ;;  %s3431_s21 = smov %s3437_s24 }
 0x144   :  { %14 = sbr.rel (!%p12_p12) target bundleno = 3 (0x3), region = 88 }

</bundles_post_ra>
